<compile_context>
chip_gen: v6e
topology: v6e:2x2x1
jax: 0.10.0
libtpu: 0.0.40
codegen_flags: <defaults>
</compile_context>

<pallas_src>
import functools

import jax
import jax.numpy as jnp
from jax.experimental import pallas as pl
from jax.experimental.pallas import tpu as pltpu

ALPHA = 0.0  # compile-time constant, matches the PyTorch module


def _round_up(x, m):
    return (x + m - 1) // m * m


def _temporal_kernel(h_ref, lv_ref, whw1_ref, w2_ref, b_ref, bhw1_ref, out_ref,
                     *, n_used, tile_n, needs_mask):
    # lv part:  lv @ W2 + b           (f32 accumulate on the MXU)
    z = jnp.dot(lv_ref[...], w2_ref[...],
                preferred_element_type=jnp.float32) + b_ref[...]

    # folded h part:  h @ (Wh^T W1) + bh W1 ; rows that were padding in the
    # reference (row >= N_prev) are zeroed with one select (also kills the
    # unspecified data of clamped / partial h blocks).
    h_part = jnp.dot(h_ref[...], whw1_ref[...],
                     preferred_element_type=jnp.float32) + bhw1_ref[...]
    if needs_mask:
        row = (pl.program_id(0) * tile_n
               + jax.lax.broadcasted_iota(jnp.int32, (tile_n, 1), 0))
        h_part = jnp.where(row < n_used, h_part, 0.0)

    out = jnp.maximum(z + h_part, 0.0)      # relu; (1 - ALPHA) == 1.0, residual dropped
    out_ref[...] = out.astype(out_ref.dtype)


@functools.partial(jax.jit, static_argnames=("tile_n", "compute_dtype"))
def temporal_step(h_lv, lv, params, *, tile_n=256, compute_dtype=None):
    """Fused recurrent update. h_lv: (N_prev, C), lv: (N, C) -> (N, C)."""
    assert ALPHA == 0.0, "Wh@W1 fold / dropped residual assume ALPHA == 0.0"
    n, c = lv.shape
    n_prev = h_lv.shape[0]
    n_used = min(n_prev, n)      # torch F.pad with negative amount truncates h
    needs_mask = n_used < n

    # Fold hidden_linear into the concat-linear (O(C^2) one-off, fused by jit).
    w_t = params["w"].T                       # (2C, C)
    w1_t, w2_t = w_t[:c], w_t[c:]             # (C, C) each
    whw1 = params["wh"].T @ w1_t              # (C, C)
    bhw1 = (params["bh"] @ w1_t)[None, :]     # (1, C)
    b = params["b"][None, :]                  # (1, C)

    if compute_dtype is not None:             # bf16 MXU inputs on v6e/v7x
        h_in = h_lv.astype(compute_dtype)
        lv_in = lv.astype(compute_dtype)
        whw1 = whw1.astype(compute_dtype)
        w2_t = w2_t.astype(compute_dtype)
    else:
        h_in, lv_in = h_lv, lv

    # (8,128)-legal row tile; don't make the block bigger than needed.
    tile = _round_up(min(tile_n, _round_up(n, 8)), 8)
    grid = (pl.cdiv(n, tile),)
    h_blocks = max(1, pl.cdiv(n_prev, tile))

    row_spec = pl.BlockSpec((tile, c), lambda i: (i, 0))
    # Fully-padded row tiles re-read a valid (already resident) h block; their
    # contribution is zeroed in-kernel, so the clamp only avoids OOB block indices.
    h_spec = pl.BlockSpec((tile, c), lambda i: (jnp.minimum(i, h_blocks - 1), 0))
    cc_spec = pl.BlockSpec((c, c), lambda i: (0, 0))
    bias_spec = pl.BlockSpec((1, c), lambda i: (0, 0))

    kernel = functools.partial(_temporal_kernel, n_used=n_used, tile_n=tile,
                               needs_mask=needs_mask)

    return pl.pallas_call(
        kernel,
        out_shape=jax.ShapeDtypeStruct((n, c), lv.dtype),
        grid_spec=pltpu.PrefetchScalarGridSpec(
            num_scalar_prefetch=0,
            grid=grid,
            in_specs=[h_spec, row_spec, cc_spec, cc_spec, bias_spec, bias_spec],
            out_specs=row_spec,
        ),
        compiler_params=pltpu.CompilerParams(
            dimension_semantics=("parallel",)),
    )(h_in, lv_in, whw1, w2_t, b, bhw1)


class TemporalLinearModule:
    """JAX/Pallas port of the PyTorch TemporalLinearModule."""

    def __init__(self, nr_output_channels, key, compute_dtype=None):
        self.nr_output_channels = nr_output_channels
        self.compute_dtype = compute_dtype
        c = nr_output_channels
        k1, k2, k3, k4 = jax.random.split(key, 4)
        # PyTorch nn.Linear default init: U(-1/sqrt(fan_in), 1/sqrt(fan_in))
        lim_lin = 1.0 / jnp.sqrt(2.0 * c)
        lim_hid = 1.0 / jnp.sqrt(1.0 * c)
        self.params = {
            "w":  jax.random.uniform(k1, (c, 2 * c), jnp.float32, -lim_lin, lim_lin),
            "b":  jax.random.uniform(k2, (c,),       jnp.float32, -lim_lin, lim_lin),
            "wh": jax.random.uniform(k3, (c, c),     jnp.float32, -lim_hid, lim_hid),
            "bh": jax.random.uniform(k4, (c,),       jnp.float32, -lim_hid, lim_hid),
        }
        self.h_lv = None

    def reset_sequence(self):
        self.h_lv = None

    def forward(self, lv, ls=None):
        if self.h_lv is None:
            assert lv.shape[1] == self.nr_output_channels, (
                "The second dimension of lv and the MLP do not match!")
            self.h_lv = lv
        else:
            lv = temporal_step(self.h_lv, lv, self.params,
                               compute_dtype=self.compute_dtype)
            self.h_lv = lv
        # TODO(synk): ls.set_values(lv) — external lattice container, no Pallas equivalent.
        return lv, ls


def _reference_step(h_lv, lv, params):
    """Pure-JAX reference of the recurrent branch (mirrors the PyTorch code)."""
    n = lv.shape[0]
    h = h_lv @ params["wh"].T + params["bh"]
    h = h[:n]                                       # torch negative pad truncates
    h_pad = jnp.pad(h, ((0, n - h.shape[0]), (0, 0)))
    cat = jnp.concatenate([h_pad, lv], axis=1)
    z = jnp.maximum(cat @ params["w"].T + params["b"], 0.0)
    return ALPHA * h_pad + (1.0 - ALPHA) * z


if __name__ == "__main__":
    key = jax.random.PRNGKey(0)
    k_mod, k1, k2, k3, k4 = jax.random.split(key, 5)

    C = 128  # lane-dense channel count (multiple of 128)
    module = TemporalLinearModule(C, k_mod)

    lv_seq = [
        jax.random.normal(k1, (200, C), jnp.float32),  # t=0: pass-through init
        jax.random.normal(k2, (256, C), jnp.float32),  # t=1: grid=1, padded h rows
        jax.random.normal(k3, (512, C), jnp.float32),  # t=2: grid=2, whole tile padded
        jax.random.normal(k4, (328, C), jnp.float32),  # t=3: truncated h, partial out tile
    ]

    # t = 0: initializes hidden state (no kernel)
    out, _ = module.forward(lv_seq[0])

    # recurrent steps: fused Pallas kernel, checked step-by-step vs the reference
    h_prev = lv_seq[0]
    for lv in lv_seq[1:]:
        out, _ = module.forward(lv)
        out = jax.block_until_ready(out)
        ref = _reference_step(h_prev, lv, module.params)
        assert out.shape == ref.shape
        assert jnp.allclose(out, ref, atol=1e-4, rtol=1e-4), (
            f"f32 mismatch vs reference: max abs err = {jnp.max(jnp.abs(out - ref))}")
        h_prev = out

    # bf16 MXU-input variant (v6e/v7x): f32 accumulation + f32 epilogue, loose check
    out_bf16 = temporal_step(lv_seq[1], lv_seq[2], module.params,
                             compute_dtype=jnp.bfloat16)
    out_bf16 = jax.block_until_ready(out_bf16)
    ref_bf16 = _reference_step(lv_seq[1], lv_seq[2], module.params)
    assert jnp.allclose(out_bf16, ref_bf16, atol=5e-2, rtol=5e-2), (
        f"bf16 mismatch: max abs err = {jnp.max(jnp.abs(out_bf16 - ref_bf16))}")

    print("KERNEL_OK")
</pallas_src>

<mosaic_0001>
module attributes {stable_mosaic.version = 11 : i64} {
  func.func @_temporal_kernel(%arg0: i32, %arg1: memref<256x128xf32, #tpu.memory_space<vmem>>, %arg2: memref<256x128xf32, #tpu.memory_space<vmem>>, %arg3: memref<128x128xf32, #tpu.memory_space<vmem>>, %arg4: memref<128x128xf32, #tpu.memory_space<vmem>>, %arg5: memref<1x128xf32, #tpu.memory_space<vmem>>, %arg6: memref<1x128xf32, #tpu.memory_space<vmem>>, %arg7: memref<256x128xf32, #tpu.memory_space<vmem>>) attributes {dimension_semantics = [#tpu.dimension_semantics<parallel>], iteration_bounds = array<i64: 1>, scalar_prefetch = 0 : i64, scratch_operands = 0 : i64, tpu.core_type = #tpu.core_type<tc>, window_params = [{transform_indices = @transform_0, window_bounds = array<i64: 256, 128>}, {transform_indices = @transform_1, window_bounds = array<i64: 256, 128>}, {pipeline_mode = #tpu.pipeline_mode<synchronous>, transform_indices = @transform_2, window_bounds = array<i64: 128, 128>}, {pipeline_mode = #tpu.pipeline_mode<synchronous>, transform_indices = @transform_3, window_bounds = array<i64: 128, 128>}, {pipeline_mode = #tpu.pipeline_mode<synchronous>, transform_indices = @transform_4, window_bounds = array<i64: 1, 128>}, {pipeline_mode = #tpu.pipeline_mode<synchronous>, transform_indices = @transform_5, window_bounds = array<i64: 1, 128>}, {transform_indices = @transform_6, window_bounds = array<i64: 256, 128>}]} {
    %c0 = arith.constant 0 : index
    %c0_0 = arith.constant 0 : index
    %0 = vector.load %arg2[%c0, %c0_0] : memref<256x128xf32, #tpu.memory_space<vmem>>, vector<256x128xf32>
    %c0_1 = arith.constant 0 : index
    %c0_2 = arith.constant 0 : index
    %1 = vector.load %arg4[%c0_1, %c0_2] : memref<128x128xf32, #tpu.memory_space<vmem>>, vector<128x128xf32>
    %cst = arith.constant dense<0.000000e+00> : vector<256x128xf32>
    %2 = tpu.matmul %0, %1, %cst {dimension_numbers = #tpu.dot_dimension_numbers<[1], [0], [0], [1], [0, 0, 1, 1], [], []>} : vector<256x128xf32>, vector<128x128xf32>, vector<256x128xf32> -> vector<256x128xf32>
    %c0_3 = arith.constant 0 : index
    %c0_4 = arith.constant 0 : index
    %3 = vector.load %arg5[%c0_3, %c0_4] : memref<1x128xf32, #tpu.memory_space<vmem>>, vector<1x128xf32>
    %4 = vector.broadcast %3 : vector<1x128xf32> to vector<256x128xf32>
    %5 = arith.addf %2, %4 : vector<256x128xf32>
    %c0_5 = arith.constant 0 : index
    %c0_6 = arith.constant 0 : index
    %6 = vector.load %arg1[%c0_5, %c0_6] : memref<256x128xf32, #tpu.memory_space<vmem>>, vector<256x128xf32>
    %c0_7 = arith.constant 0 : index
    %c0_8 = arith.constant 0 : index
    %7 = vector.load %arg3[%c0_7, %c0_8] : memref<128x128xf32, #tpu.memory_space<vmem>>, vector<128x128xf32>
    %cst_9 = arith.constant dense<0.000000e+00> : vector<256x128xf32>
    %8 = tpu.matmul %6, %7, %cst_9 {dimension_numbers = #tpu.dot_dimension_numbers<[1], [0], [0], [1], [0, 0, 1, 1], [], []>} : vector<256x128xf32>, vector<128x128xf32>, vector<256x128xf32> -> vector<256x128xf32>
    %c0_10 = arith.constant 0 : index
    %c0_11 = arith.constant 0 : index
    %9 = vector.load %arg6[%c0_10, %c0_11] : memref<1x128xf32, #tpu.memory_space<vmem>>, vector<1x128xf32>
    %10 = vector.broadcast %9 : vector<1x128xf32> to vector<256x128xf32>
    %11 = arith.addf %8, %10 : vector<256x128xf32>
    %c256_i32 = arith.constant 256 : i32
    %12 = arith.muli %arg0, %c256_i32 : i32
    %13 = tpu.iota {dimensions = array<i32: 0>} : vector<256x1xi32>
    %14 = vector.broadcast %12 : i32 to vector<256x1xi32>
    %15 = arith.addi %14, %13 : vector<256x1xi32>
    %c200_i32 = arith.constant 200 : i32
    %16 = vector.broadcast %c200_i32 : i32 to vector<256x1xi32>
    %17 = arith.cmpi slt, %15, %16 : vector<256x1xi32>
    %cst_12 = arith.constant 0.000000e+00 : f32
    %18 = vector.shape_cast %17 : vector<256x1xi1> to vector<256x1xi1>
    %19 = vector.broadcast %18 : vector<256x1xi1> to vector<256x128xi1>
    %20 = vector.broadcast %cst_12 : f32 to vector<256x128xf32>
    %21 = arith.select %19, %11, %20 : vector<256x128xi1>, vector<256x128xf32>
    %22 = arith.addf %5, %21 : vector<256x128xf32>
    %cst_13 = arith.constant 0.000000e+00 : f32
    %23 = vector.broadcast %cst_13 : f32 to vector<256x128xf32>
    %24 = arith.maximumf %22, %23 : vector<256x128xf32>
    %c0_14 = arith.constant 0 : index
    %c0_15 = arith.constant 0 : index
    %25 = vector.load %arg7[%c0_14, %c0_15] : memref<256x128xf32, #tpu.memory_space<vmem>>, vector<256x128xf32>
    tpu.vector_store %arg7[%c0_14, %c0_15], %24 {strides = array<i32>} : memref<256x128xf32, #tpu.memory_space<vmem>>, vector<256x128xf32>,
    return
  }
  func.func @transform_0(%arg0: i32) -> (i32, i32) {
    %c0_i32 = arith.constant 0 : i32
    %0 = arith.minsi %arg0, %c0_i32 : i32
    %c0_i32_0 = arith.constant 0 : i32
    %c0_i32_1 = arith.constant 0 : i32
    return %0, %c0_i32_0 : i32, i32
  }
  func.func @transform_1(%arg0: i32) -> (i32, i32) {
    %c0_i32 = arith.constant 0 : i32
    %c0_i32_0 = arith.constant 0 : i32
    return %arg0, %c0_i32 : i32, i32
  }
  func.func @transform_2(%arg0: i32) -> (i32, i32) {
    %c0_i32 = arith.constant 0 : i32
    %c0_i32_0 = arith.constant 0 : i32
    %c0_i32_1 = arith.constant 0 : i32
    return %c0_i32, %c0_i32_0 : i32, i32
  }
  func.func @transform_3(%arg0: i32) -> (i32, i32) {
    %c0_i32 = arith.constant 0 : i32
    %c0_i32_0 = arith.constant 0 : i32
    %c0_i32_1 = arith.constant 0 : i32
    return %c0_i32, %c0_i32_0 : i32, i32
  }
  func.func @transform_4(%arg0: i32) -> (i32, i32) {
    %c0_i32 = arith.constant 0 : i32
    %c0_i32_0 = arith.constant 0 : i32
    %c0_i32_1 = arith.constant 0 : i32
    return %c0_i32, %c0_i32_0 : i32, i32
  }
  func.func @transform_5(%arg0: i32) -> (i32, i32) {
    %c0_i32 = arith.constant 0 : i32
    %c0_i32_0 = arith.constant 0 : i32
    %c0_i32_1 = arith.constant 0 : i32
    return %c0_i32, %c0_i32_0 : i32, i32
  }
  func.func @transform_6(%arg0: i32) -> (i32, i32) {
    %c0_i32 = arith.constant 0 : i32
    %c0_i32_0 = arith.constant 0 : i32
    return %arg0, %c0_i32 : i32, i32
  }
}

</mosaic_0001>

<bundles_post_ra>
// kernel: temporal_step.1
= control target key start
LH: loop header
LB: loop body
LE: loop exit
PB: predicated region body
PF: predicated region fallthrough
CT: control target
= control target key end

     0   :  { %s1570_s0 = inlined_call_operand.vmem [shape: f32[200,128], index: 0, kind: input, shape index: {}]   ;;  %s1571_s1 = inlined_call_operand.vmem [shape: f32[256,128], index: 1, kind: input, shape index: {}]   ;;  %s1572_s2 = inlined_call_operand.vmem [shape: f32[128,128], index: 2, kind: input, shape index: {}]   ;;  %s1573_s3 = inlined_call_operand.vmem [shape: f32[128,128], index: 3, kind: input, shape index: {}]   ;;  %s1574_s4 = inlined_call_operand.vmem [shape: f32[1,128], index: 4, kind: input, shape index: {}]   ;;  %s1575_s5 = inlined_call_operand.vmem [shape: f32[1,128], index: 5, kind: input, shape index: {}]   ;;  %s1576_s6 = inlined_call_operand.hbm [shape: f32[256,128], index: 6, kind: output, shape index: {}]  }
   0x1   :  { %v71_v0 = vld [vmem:[%s1573_s3 + $0x78] sm:$0xff]  ;;  %v70_v2 = vld [vmem:[%s1573_s3 + $0x70] sm:$0xff]  ;;  %v69_v4 = vld [vmem:[%s1573_s3 + $0x68] sm:$0xff] }
   0x2   :  { %v351_v1 = vld [vmem:[%s1572_s2 + $0x78] sm:$0xff]  ;;  %989 = vmatprep.subr.mxu0 %v71_v0  ;;  %v350_v3 = vld [vmem:[%s1572_s2 + $0x70] sm:$0xff]  ;;  %v349_v5 = vld [vmem:[%s1572_s2 + $0x68] sm:$0xff] }
   0x3   :  { %1069 = vmatprep.subr.mxu1 %v351_v1  ;;  %990 = vmatpush3.msra.mxu0 %v71_v0  ;;  %v68_v6 = vld [vmem:[%s1573_s3 + $0x60] sm:$0xff]  ;;  %v67_v8 = vld [vmem:[%s1573_s3 + $0x58] sm:$0xff]  ;;  %v66_v10 = vld [vmem:[%s1573_s3 + $0x50] sm:$0xff] }
   0x4   :  { %1070 = vmatpush3.msra.mxu1 %v351_v1  ;;  %991 = vmatprep.subr.mxu0 %v70_v2  ;;  %v348_v7 = vld [vmem:[%s1572_s2 + $0x60] sm:$0xff]  ;;  %v347_v9 = vld [vmem:[%s1572_s2 + $0x58] sm:$0xff]  ;;  %v346_v11 = vld [vmem:[%s1572_s2 + $0x50] sm:$0xff] }
   0x5   :  { %1071 = vmatprep.subr.mxu1 %v350_v3  ;;  %992 = vmatpush3.msra.mxu0 %v70_v2  ;;  %v65_v12 = vld [vmem:[%s1573_s3 + $0x48] sm:$0xff]  ;;  %v64_v14 = vld [vmem:[%s1573_s3 + $0x40] sm:$0xff]  ;;  %v63_v16 = vld [vmem:[%s1573_s3 + $0x38] sm:$0xff] }
   0x6   :  { %1072 = vmatpush3.msra.mxu1 %v350_v3  ;;  %993 = vmatprep.subr.mxu0 %v69_v4  ;;  %v345_v13 = vld [vmem:[%s1572_s2 + $0x48] sm:$0xff]  ;;  %v344_v15 = vld [vmem:[%s1572_s2 + $0x40] sm:$0xff]  ;;  %v343_v17 = vld [vmem:[%s1572_s2 + $0x38] sm:$0xff] }
   0x7   :  { %1073 = vmatprep.subr.mxu1 %v349_v5  ;;  %994 = vmatpush3.msra.mxu0 %v69_v4  ;;  %v62_v18 = vld [vmem:[%s1573_s3 + $0x30] sm:$0xff]  ;;  %v61_v20 = vld [vmem:[%s1573_s3 + $0x28] sm:$0xff]  ;;  %v60_v22 = vld [vmem:[%s1573_s3 + $0x20] sm:$0xff] }
   0x8   :  { %1074 = vmatpush3.msra.mxu1 %v349_v5  ;;  %995 = vmatprep.subr.mxu0 %v68_v6  ;;  %v342_v19 = vld [vmem:[%s1572_s2 + $0x30] sm:$0xff]  ;;  %v341_v21 = vld [vmem:[%s1572_s2 + $0x28] sm:$0xff]  ;;  %v340_v23 = vld [vmem:[%s1572_s2 + $0x20] sm:$0xff] }
   0x9   :  { %1075 = vmatprep.subr.mxu1 %v348_v7  ;;  %996 = vmatpush3.msra.mxu0 %v68_v6  ;;  %v59_v24 = vld [vmem:[%s1573_s3 + $0x18] sm:$0xff]  ;;  %v58_v26 = vld [vmem:[%s1573_s3 + $0x10] sm:$0xff]  ;;  %v57_v28 = vld [vmem:[%s1573_s3 + $0x8] sm:$0xff] }
   0xa   :  { %1076 = vmatpush3.msra.mxu1 %v348_v7  ;;  %997 = vmatprep.subr.mxu0 %v67_v8  ;;  %v339_v25 = vld [vmem:[%s1572_s2 + $0x18] sm:$0xff]  ;;  %v338_v27 = vld [vmem:[%s1572_s2 + $0x10] sm:$0xff]  ;;  %v337_v29 = vld [vmem:[%s1572_s2 + $0x8] sm:$0xff] }
   0xb   :  { %1077 = vmatprep.subr.mxu1 %v347_v9  ;;  %998 = vmatpush3.msra.mxu0 %v67_v8  ;;  %v56_v30 = vld [vmem:[%s1573_s3] sm:$0xff]  ;;  %v25_v34 = vld [vmem:[%s1571_s1 + $0x8] sm:$0xff]  ;;  %v26_v36 = vld [vmem:[%s1571_s1 + $0x10] sm:$0xff] }
   0xc   :  { %1078 = vmatpush3.msra.mxu1 %v347_v9  ;;  %999 = vmatprep.subr.mxu0 %v66_v10  ;;  %v336_v31 = vld [vmem:[%s1572_s2] sm:$0xff]  ;;  %v305_v35 = vld [vmem:[%s1570_s0 + $0x8] sm:$0xff]  ;;  %v306_v37 = vld [vmem:[%s1570_s0 + $0x10] sm:$0xff] }
   0xd   :  { %1079 = vmatprep.subr.mxu1 %v346_v11  ;;  %1000 = vmatpush3.msra.mxu0 %v66_v10  ;;  %v24_v32 = vld [vmem:[%s1571_s1] sm:$0xff] }
   0xe   :  { %1080 = vmatpush3.msra.mxu1 %v346_v11  ;;  %1001 = vmatprep.subr.mxu0 %v65_v12  ;;  %v304_v33 = vld [vmem:[%s1570_s0] sm:$0xff] }
   0xf   :  { %1081 = vmatprep.subr.mxu1 %v345_v13  ;;  %1002 = vmatpush3.msra.mxu0 %v65_v12 }
  0x10   :  { %1082 = vmatpush3.msra.mxu1 %v345_v13  ;;  %1003 = vmatprep.subr.mxu0 %v64_v14 }
  0x11   :  { %1083 = vmatprep.subr.mxu1 %v344_v15  ;;  %1004 = vmatpush3.msra.mxu0 %v64_v14 }
  0x12   :  { %1084 = vmatpush3.msra.mxu1 %v344_v15  ;;  %1005 = vmatprep.subr.mxu0 %v63_v16 }
  0x13   :  { %1085 = vmatprep.subr.mxu1 %v343_v17  ;;  %1006 = vmatpush3.msra.mxu0 %v63_v16 }
  0x14   :  { %1086 = vmatpush3.msra.mxu1 %v343_v17  ;;  %1007 = vmatprep.subr.mxu0 %v62_v18 }
  0x15   :  { %1087 = vmatprep.subr.mxu1 %v342_v19  ;;  %1008 = vmatpush3.msra.mxu0 %v62_v18 }
  0x16   :  { %1088 = vmatpush3.msra.mxu1 %v342_v19  ;;  %1009 = vmatprep.subr.mxu0 %v61_v20 }
  0x17   :  { %1089 = vmatprep.subr.mxu1 %v341_v21  ;;  %1010 = vmatpush3.msra.mxu0 %v61_v20 }
  0x18   :  { %1090 = vmatpush3.msra.mxu1 %v341_v21  ;;  %1011 = vmatprep.subr.mxu0 %v60_v22 }
  0x19   :  { %1091 = vmatprep.subr.mxu1 %v340_v23  ;;  %1012 = vmatpush3.msra.mxu0 %v60_v22 }
  0x1a   :  { %1092 = vmatpush3.msra.mxu1 %v340_v23  ;;  %1013 = vmatprep.subr.mxu0 %v59_v24 }
  0x1b   :  { %1093 = vmatprep.subr.mxu1 %v339_v25  ;;  %1014 = vmatpush3.msra.mxu0 %v59_v24 }
  0x1c   :  { %1094 = vmatpush3.msra.mxu1 %v339_v25  ;;  %1015 = vmatprep.subr.mxu0 %v58_v26 }
  0x1d   :  { %1095 = vmatprep.subr.mxu1 %v338_v27  ;;  %1016 = vmatpush3.msra.mxu0 %v58_v26 }
  0x1e   :  { %1096 = vmatpush3.msra.mxu1 %v338_v27  ;;  %1017 = vmatprep.subr.mxu0 %v57_v28 }
  0x1f   :  { %1097 = vmatprep.subr.mxu1 %v337_v29  ;;  %1018 = vmatpush3.msra.mxu0 %v57_v28 }
  0x20   :  { %1098 = vmatpush3.msra.mxu1 %v337_v29  ;;  %1019 = vmatprep.subr.mxu0 %v56_v30 }
  0x21   :  { %1099 = vmatprep.subr.mxu1 %v336_v31  ;;  %1020 = vmatpush3.msra.mxu0 %v56_v30 }
  0x22   :  { %1021 = vmatprep.mubr.f32.mxu0 %v24_v32 }
  0x23   :  { %11 = vsyncpa [#allocation3], 0  ;;  %1100 = vmatpush3.msra.mxu1 %v336_v31  ;;  %1101 = vmatprep.mubr.f32.mxu1 %v304_v33  ;;  %v27_v38 = vld [vmem:[%s1571_s1 + $0x18] sm:$0xff]  ;;  %v28_v40 = vld [vmem:[%s1571_s1 + $0x20] sm:$0xff] }
  0x24   :  { %1022 = vmatmul.mubr.f32.vlgmr.msra.gmra.mxu0 %v25_v34  ;;  %1102 = vmatmul.mubr.f32.vlgmr.msra.gmra.mxu1 %v305_v35  ;;  %v307_v39 = vld [vmem:[%s1570_s0 + $0x18] sm:$0xff]  ;;  %v308_v41 = vld [vmem:[%s1570_s0 + $0x20] sm:$0xff]  ;;  %v29_v42 = vld [vmem:[%s1571_s1 + $0x28] sm:$0xff] }
  0x25   :  { %1024 = vmatprep.mubr.f32.mxu0 %v26_v36  ;;  %1104 = vmatprep.mubr.f32.mxu1 %v306_v37  ;;  %v309_v43 = vld [vmem:[%s1570_s0 + $0x28] sm:$0xff]  ;;  %v30_v44 = vld [vmem:[%s1571_s1 + $0x30] sm:$0xff]  ;;  %v31_v46 = vld [vmem:[%s1571_s1 + $0x38] sm:$0xff] }
  0x26   :  { %v310_v45 = vld [vmem:[%s1570_s0 + $0x30] sm:$0xff]  ;;  %v311_v47 = vld [vmem:[%s1570_s0 + $0x38] sm:$0xff]  ;;  %v32_v48 = vld [vmem:[%s1571_s1 + $0x40] sm:$0xff] }
  0x27   :  { %v312_v49 = vld [vmem:[%s1570_s0 + $0x40] sm:$0xff]  ;;  %v33_v50 = vld [vmem:[%s1571_s1 + $0x48] sm:$0xff]  ;;  %v34_v52 = vld [vmem:[%s1571_s1 + $0x50] sm:$0xff] }
  0x28   :  { %1025 = vmatmul.mubr.f32.gmra.mxu0 %v27_v38  ;;  %1105 = vmatmul.mubr.f32.gmra.mxu1 %v307_v39  ;;  %v313_v51 = vld [vmem:[%s1570_s0 + $0x48] sm:$0xff]  ;;  %v314_v53 = vld [vmem:[%s1570_s0 + $0x50] sm:$0xff]  ;;  %v35_v54 = vld [vmem:[%s1571_s1 + $0x58] sm:$0xff] }
  0x29   :  { %1027 = vmatprep.mubr.f32.mxu0 %v28_v40  ;;  %1107 = vmatprep.mubr.f32.mxu1 %v308_v41  ;;  %v315_v55 = vld [vmem:[%s1570_s0 + $0x58] sm:$0xff]  ;;  %v36_v56 = vld [vmem:[%s1571_s1 + $0x60] sm:$0xff]  ;;  %v37_v58 = vld [vmem:[%s1571_s1 + $0x68] sm:$0xff] }
  0x2a   :  { %v316_v57 = vld [vmem:[%s1570_s0 + $0x60] sm:$0xff]  ;;  %v317_v59 = vld [vmem:[%s1570_s0 + $0x68] sm:$0xff]  ;;  %v38_v60 = vld [vmem:[%s1571_s1 + $0x70] sm:$0xff] }
  0x2b   :  { %v318_v61 = vld [vmem:[%s1570_s0 + $0x70] sm:$0xff]  ;;  %v39_v62 = vld [vmem:[%s1571_s1 + $0x78] sm:$0xff]  ;;  %v40_v0 = vld [vmem:[%s1571_s1 + $0x80] sm:$0xff] }
  0x2c   :  { %1028 = vmatmul.mubr.f32.gmra.mxu0 %v29_v42  ;;  %1108 = vmatmul.mubr.f32.gmra.mxu1 %v309_v43  ;;  %v319_v63 = vld [vmem:[%s1570_s0 + $0x78] sm:$0xff]  ;;  %v320_v1 = vld [vmem:[%s1570_s0 + $0x80] sm:$0xff]  ;;  %v41_v2 = vld [vmem:[%s1571_s1 + $0x88] sm:$0xff] }
  0x2d   :  { %1030 = vmatprep.mubr.f32.mxu0 %v30_v44  ;;  %1110 = vmatprep.mubr.f32.mxu1 %v310_v45  ;;  %v321_v3 = vld [vmem:[%s1570_s0 + $0x88] sm:$0xff]  ;;  %v42_v4 = vld [vmem:[%s1571_s1 + $0x90] sm:$0xff]  ;;  %v43_v6 = vld [vmem:[%s1571_s1 + $0x98] sm:$0xff] }
  0x2e   :  { %v322_v5 = vld [vmem:[%s1570_s0 + $0x90] sm:$0xff]  ;;  %v323_v7 = vld [vmem:[%s1570_s0 + $0x98] sm:$0xff]  ;;  %v44_v8 = vld [vmem:[%s1571_s1 + $0xa0] sm:$0xff] }
  0x2f   :  { %v324_v9 = vld [vmem:[%s1570_s0 + $0xa0] sm:$0xff]  ;;  %v45_v10 = vld [vmem:[%s1571_s1 + $0xa8] sm:$0xff]  ;;  %v46_v12 = vld [vmem:[%s1571_s1 + $0xb0] sm:$0xff] }
  0x30   :  { %1031 = vmatmul.mubr.f32.gmra.mxu0 %v31_v46  ;;  %1111 = vmatmul.mubr.f32.gmra.mxu1 %v311_v47  ;;  %v325_v11 = vld [vmem:[%s1570_s0 + $0xa8] sm:$0xff]  ;;  %v326_v13 = vld [vmem:[%s1570_s0 + $0xb0] sm:$0xff]  ;;  %v47_v14 = vld [vmem:[%s1571_s1 + $0xb8] sm:$0xff] }
  0x31   :  { %1033 = vmatprep.mubr.f32.mxu0 %v32_v48  ;;  %1113 = vmatprep.mubr.f32.mxu1 %v312_v49  ;;  %v327_v15 = vld [vmem:[%s1570_s0 + $0xb8] sm:$0xff]  ;;  %v48_v16 = vld [vmem:[%s1571_s1 + $0xc0] sm:$0xff]  ;;  %v49_v18 = vld [vmem:[%s1571_s1 + $0xc8] sm:$0xff] }
  0x32   :  { %v328_v17 = vld [vmem:[%s1570_s0 + $0xc0] sm:$0xff]  ;;  %v329_v19 = vld [vmem:[%s1570_s0 + $0xc8] sm:$0xff]  ;;  %v50_v20 = vld [vmem:[%s1571_s1 + $0xd0] sm:$0xff] }
  0x33   :  { %v330_v21 = vld [vmem:[%s1570_s0 + $0xd0] sm:$0xff]  ;;  %v51_v22 = vld [vmem:[%s1571_s1 + $0xd8] sm:$0xff]  ;;  %v52_v24 = vld [vmem:[%s1571_s1 + $0xe0] sm:$0xff] }
  0x34   :  { %1034 = vmatmul.mubr.f32.gmra.mxu0 %v33_v50  ;;  %1114 = vmatmul.mubr.f32.gmra.mxu1 %v313_v51  ;;  %v331_v23 = vld [vmem:[%s1570_s0 + $0xd8] sm:$0xff]  ;;  %v332_v25 = vld [vmem:[%s1570_s0 + $0xe0] sm:$0xff]  ;;  %v53_v26 = vld [vmem:[%s1571_s1 + $0xe8] sm:$0xff] }
  0x35   :  { %1036 = vmatprep.mubr.f32.mxu0 %v34_v52  ;;  %1116 = vmatprep.mubr.f32.mxu1 %v314_v53  ;;  %v333_v27 = vld [vmem:[%s1570_s0 + $0xe8] sm:$0xff]  ;;  %v54_v28 = vld [vmem:[%s1571_s1 + $0xf0] sm:$0xff]  ;;  %v55_v30 = vld [vmem:[%s1571_s1 + $0xf8] sm:$0xff] }
  0x36   :  { %v334_v29 = vld [vmem:[%s1570_s0 + $0xf0] sm:$0xff]  ;;  %v335_v31 = vld [vmem:[%s1570_s0 + $0xf8] sm:$0xff]  ;;  %v1503_v32 = vld [vmem:[%s1574_s4] ss:$0 sm:$0xff]  ;;  %s1174_s0 = smov [#allocation2]  }
  0x37   :  { %v1508_v33 = vld [vmem:[%s1575_s5] ss:$0 sm:$0xff]  ;;  %s880_s1 = sshll.u32 %s1174_s0, 4  ;;  %s881_s1 = int_to_ptr.vmem [resolvable:$true] %s880_s1 }
  0x38   :  { %1037 = vmatmul.mubr.f32.gmra.mxu0 %v35_v54  ;;  %1117 = vmatmul.mubr.f32.gmra.mxu1 %v315_v55  ;;  %s1152_s4 = scalar_lea.vmem %s881_s1, 4096  ;;  %p1157_p1 = scmp.lt.s32.totalorder %s881_s1, %s881_s1 }
  0x39   :  { %1039 = vmatprep.mubr.f32.mxu0 %v36_v56  ;;  %1119 = vmatprep.mubr.f32.mxu1 %v316_v57  ;;  %p1153_p0 = scmp.ne.s32.totalorder %s881_s1, %s1152_s4  ;;  %p1158_p2 = scmp.lt.s32.totalorder %s1152_s4, %s1152_s4 }
  0x3b   :  { %p1159_p3 = por %p1158_p2, %p1157_p1 }
  0x3c   :  { %1040 = vmatmul.mubr.f32.gmra.mxu0 %v37_v58  ;;  %1120 = vmatmul.mubr.f32.gmra.mxu1 %v317_v59 }
  0x3d   :  { %1042 = vmatprep.mubr.f32.mxu0 %v38_v60  ;;  %1122 = vmatprep.mubr.f32.mxu1 %v318_v61  ;;  %p1160_p4 = pnand %p1159_p3, %p1153_p0 }
  0x40   :  { %1043 = vmatmul.mubr.f32.gmra.mxu0 %v39_v62  ;;  %1123 = vmatmul.mubr.f32.gmra.mxu1 %v319_v63 }
  0x41   :  { %1045 = vmatprep.mubr.f32.mxu0 %v40_v0  ;;  %1125 = vmatprep.mubr.f32.mxu1 %v320_v1 }
  0x44   :  { %1046 = vmatmul.mubr.f32.gmra.mxu0 %v41_v2  ;;  %1126 = vmatmul.mubr.f32.gmra.mxu1 %v321_v3 }
  0x45   :  { %1048 = vmatprep.mubr.f32.mxu0 %v42_v4  ;;  %1128 = vmatprep.mubr.f32.mxu1 %v322_v5 }
  0x48   :  { %1049 = vmatmul.mubr.f32.gmra.mxu0 %v43_v6  ;;  %1129 = vmatmul.mubr.f32.gmra.mxu1 %v323_v7 }
  0x49   :  { %1051 = vmatprep.mubr.f32.mxu0 %v44_v8  ;;  %1131 = vmatprep.mubr.f32.mxu1 %v324_v9 }
  0x4c   :  { %1052 = vmatmul.mubr.f32.gmra.mxu0 %v45_v10  ;;  %1132 = vmatmul.mubr.f32.gmra.mxu1 %v325_v11 }
  0x4d   :  { %1054 = vmatprep.mubr.f32.mxu0 %v46_v12  ;;  %1134 = vmatprep.mubr.f32.mxu1 %v326_v13 }
  0x50   :  { %1055 = vmatmul.mubr.f32.gmra.mxu0 %v47_v14  ;;  %1135 = vmatmul.mubr.f32.gmra.mxu1 %v327_v15 }
  0x51   :  { %1057 = vmatprep.mubr.f32.mxu0 %v48_v16  ;;  %1137 = vmatprep.mubr.f32.mxu1 %v328_v17 }
  0x54   :  { %1058 = vmatmul.mubr.f32.gmra.mxu0 %v49_v18  ;;  %1138 = vmatmul.mubr.f32.gmra.mxu1 %v329_v19 }
  0x55   :  { %1060 = vmatprep.mubr.f32.mxu0 %v50_v20  ;;  %1140 = vmatprep.mubr.f32.mxu1 %v330_v21 }
  0x58   :  { %1061 = vmatmul.mubr.f32.gmra.mxu0 %v51_v22  ;;  %1141 = vmatmul.mubr.f32.gmra.mxu1 %v331_v23 }
  0x59   :  { %1063 = vmatprep.mubr.f32.mxu0 %v52_v24  ;;  %1143 = vmatprep.mubr.f32.mxu1 %v332_v25 }
  0x5c   :  { %1064 = vmatmul.mubr.f32.gmra.mxu0 %v53_v26  ;;  %1144 = vmatmul.mubr.f32.gmra.mxu1 %v333_v27 }
  0x5d   :  { %1066 = vmatprep.mubr.f32.mxu0 %v54_v28  ;;  %1146 = vmatprep.mubr.f32.mxu1 %v334_v29 }
  0x60   :  { %1067 = vmatmul.mubr.f32.gmra.mxu0 %v55_v30  ;;  %1147 = vmatmul.mubr.f32.gmra.mxu1 %v335_v31 }
  0xe4   :  { %v1023_v34 = vpop.f32.mrf.mxu0  ;;  %v1103_v35 = vpop.f32.mrf.mxu1 }
  0xe5   :  { %v151_v36 = vadd.f32 %v1023_v34, %v1503_v32  ;;  %v431_v37 = vadd.f32 %v1103_v35, %v1508_v33 }
  0xe6   :  { %v145_v38 = vpop.f32.mrf.mxu0  ;;  %v425_v39 = vpop.f32.mrf.mxu1 }
  0xe7   :  { %v780_v40 = vadd.f32 %v431_v37, %v151_v36  ;;  %v146_v41 = vadd.f32 %v1503_v32, %v145_v38  ;;  %v426_v42 = vadd.f32 %v1508_v33, %v425_v39 }
  0xe8   :  { %v1026_v43 = vpop.f32.mrf.mxu0  ;;  %v1106_v44 = vpop.f32.mrf.mxu1 }
  0xe9   :  { %v812_v45 = vmax.f32 %v780_v40, 0.0  ;;  %v779_v46 = vadd.f32 %v426_v42, %v146_v41  ;;  %v161_v47 = vadd.f32 %v1026_v43, %v1503_v32  ;;  %v441_v48 = vadd.f32 %v1106_v44, %v1508_v33 }
  0xea   :  { %v155_v49 = vpop.f32.mrf.mxu0  ;;  %v435_v50 = vpop.f32.mrf.mxu1 }
  0xeb   :  { %844 = vst [vmem:[#allocation2 + $0x8] sm:$0xff] %v812_v45  ;;  %v811_v51 = vmax.f32 %v779_v46, 0.0  ;;  %v782_v52 = vadd.f32 %v441_v48, %v161_v47  ;;  %v156_v53 = vadd.f32 %v1503_v32, %v155_v49  ;;  %v436_v54 = vadd.f32 %v1508_v33, %v435_v50 }
  0xec   :  { %v1029_v55 = vpop.f32.mrf.mxu0  ;;  %v1109_v56 = vpop.f32.mrf.mxu1 }
  0xed   :  { %843 = vst [vmem:[#allocation2] sm:$0xff] %v811_v51  ;;  %v814_v57 = vmax.f32 %v782_v52, 0.0  ;;  %v781_v58 = vadd.f32 %v436_v54, %v156_v53  ;;  %v171_v59 = vadd.f32 %v1029_v55, %v1503_v32  ;;  %v451_v60 = vadd.f32 %v1109_v56, %v1508_v33 }
  0xee   :  { %v165_v61 = vpop.f32.mrf.mxu0  ;;  %v445_v62 = vpop.f32.mrf.mxu1 }
  0xef   :  { %846 = vst [vmem:[#allocation2 + $0x18] sm:$0xff] %v814_v57  ;;  %v813_v63 = vmax.f32 %v781_v58, 0.0  ;;  %v784_v0 = vadd.f32 %v451_v60, %v171_v59  ;;  %v166_v1 = vadd.f32 %v1503_v32, %v165_v61  ;;  %v446_v2 = vadd.f32 %v1508_v33, %v445_v62 }
  0xf0   :  { %v1032_v3 = vpop.f32.mrf.mxu0  ;;  %v1112_v4 = vpop.f32.mrf.mxu1 }
  0xf1   :  { %845 = vst [vmem:[#allocation2 + $0x10] sm:$0xff] %v813_v63  ;;  %v816_v5 = vmax.f32 %v784_v0, 0.0  ;;  %v783_v6 = vadd.f32 %v446_v2, %v166_v1  ;;  %v181_v7 = vadd.f32 %v1032_v3, %v1503_v32  ;;  %v461_v8 = vadd.f32 %v1112_v4, %v1508_v33 }
  0xf2   :  { %v175_v9 = vpop.f32.mrf.mxu0  ;;  %v455_v10 = vpop.f32.mrf.mxu1 }
  0xf3   :  { %848 = vst [vmem:[#allocation2 + $0x28] sm:$0xff] %v816_v5  ;;  %v815_v11 = vmax.f32 %v783_v6, 0.0  ;;  %v786_v12 = vadd.f32 %v461_v8, %v181_v7  ;;  %v176_v13 = vadd.f32 %v1503_v32, %v175_v9  ;;  %v456_v14 = vadd.f32 %v1508_v33, %v455_v10 }
  0xf4   :  { %v1035_v15 = vpop.f32.mrf.mxu0  ;;  %v1115_v16 = vpop.f32.mrf.mxu1 }
  0xf5   :  { %847 = vst [vmem:[#allocation2 + $0x20] sm:$0xff] %v815_v11  ;;  %v818_v17 = vmax.f32 %v786_v12, 0.0  ;;  %v785_v18 = vadd.f32 %v456_v14, %v176_v13  ;;  %v191_v19 = vadd.f32 %v1035_v15, %v1503_v32  ;;  %v471_v20 = vadd.f32 %v1115_v16, %v1508_v33 }
  0xf6   :  { %v185_v21 = vpop.f32.mrf.mxu0  ;;  %v465_v22 = vpop.f32.mrf.mxu1 }
  0xf7   :  { %850 = vst [vmem:[#allocation2 + $0x38] sm:$0xff] %v818_v17  ;;  %v817_v23 = vmax.f32 %v785_v18, 0.0  ;;  %v788_v24 = vadd.f32 %v471_v20, %v191_v19  ;;  %v186_v25 = vadd.f32 %v1503_v32, %v185_v21  ;;  %v466_v26 = vadd.f32 %v1508_v33, %v465_v22 }
  0xf8   :  { %v1038_v27 = vpop.f32.mrf.mxu0  ;;  %v1118_v28 = vpop.f32.mrf.mxu1 }
  0xf9   :  { %849 = vst [vmem:[#allocation2 + $0x30] sm:$0xff] %v817_v23  ;;  %v820_v29 = vmax.f32 %v788_v24, 0.0  ;;  %v787_v30 = vadd.f32 %v466_v26, %v186_v25  ;;  %v201_v31 = vadd.f32 %v1038_v27, %v1503_v32  ;;  %v481_v34 = vadd.f32 %v1118_v28, %v1508_v33 }
  0xfa   :  { %v195_v35 = vpop.f32.mrf.mxu0  ;;  %v475_v36 = vpop.f32.mrf.mxu1 }
  0xfb   :  { %852 = vst [vmem:[#allocation2 + $0x48] sm:$0xff] %v820_v29  ;;  %v819_v37 = vmax.f32 %v787_v30, 0.0  ;;  %v790_v38 = vadd.f32 %v481_v34, %v201_v31  ;;  %v196_v39 = vadd.f32 %v1503_v32, %v195_v35  ;;  %v476_v40 = vadd.f32 %v1508_v33, %v475_v36 }
  0xfc   :  { %v1041_v41 = vpop.f32.mrf.mxu0  ;;  %v1121_v42 = vpop.f32.mrf.mxu1 }
  0xfd   :  { %851 = vst [vmem:[#allocation2 + $0x40] sm:$0xff] %v819_v37  ;;  %v822_v43 = vmax.f32 %v790_v38, 0.0  ;;  %v789_v44 = vadd.f32 %v476_v40, %v196_v39  ;;  %v211_v45 = vadd.f32 %v1041_v41, %v1503_v32  ;;  %v491_v46 = vadd.f32 %v1121_v42, %v1508_v33 }
  0xfe   :  { %v205_v47 = vpop.f32.mrf.mxu0  ;;  %v485_v48 = vpop.f32.mrf.mxu1 }
  0xff   :  { %854 = vst [vmem:[#allocation2 + $0x58] sm:$0xff] %v822_v43  ;;  %v821_v49 = vmax.f32 %v789_v44, 0.0  ;;  %v792_v50 = vadd.f32 %v491_v46, %v211_v45  ;;  %v206_v51 = vadd.f32 %v1503_v32, %v205_v47  ;;  %v486_v52 = vadd.f32 %v1508_v33, %v485_v48 }
 0x100   :  { %v1044_v53 = vpop.f32.mrf.mxu0  ;;  %v1124_v54 = vpop.f32.mrf.mxu1 }
 0x101   :  { %853 = vst [vmem:[#allocation2 + $0x50] sm:$0xff] %v821_v49  ;;  %v824_v55 = vmax.f32 %v792_v50, 0.0  ;;  %v791_v56 = vadd.f32 %v486_v52, %v206_v51  ;;  %v221_v57 = vadd.f32 %v1044_v53, %v1503_v32  ;;  %v501_v58 = vadd.f32 %v1124_v54, %v1508_v33 }
 0x102   :  { %v215_v59 = vpop.f32.mrf.mxu0  ;;  %v495_v60 = vpop.f32.mrf.mxu1 }
 0x103   :  { %856 = vst [vmem:[#allocation2 + $0x68] sm:$0xff] %v824_v55  ;;  %v823_v61 = vmax.f32 %v791_v56, 0.0  ;;  %v794_v62 = vadd.f32 %v501_v58, %v221_v57  ;;  %v216_v63 = vadd.f32 %v1503_v32, %v215_v59  ;;  %v496_v0 = vadd.f32 %v1508_v33, %v495_v60 }
 0x104   :  { %v1047_v1 = vpop.f32.mrf.mxu0  ;;  %v1127_v2 = vpop.f32.mrf.mxu1 }
 0x105   :  { %855 = vst [vmem:[#allocation2 + $0x60] sm:$0xff] %v823_v61  ;;  %v826_v3 = vmax.f32 %v794_v62, 0.0  ;;  %v793_v4 = vadd.f32 %v496_v0, %v216_v63  ;;  %v231_v5 = vadd.f32 %v1047_v1, %v1503_v32  ;;  %v511_v6 = vadd.f32 %v1127_v2, %v1508_v33 }
 0x106   :  { %v225_v7 = vpop.f32.mrf.mxu0  ;;  %v505_v8 = vpop.f32.mrf.mxu1 }
 0x107   :  { %858 = vst [vmem:[#allocation2 + $0x78] sm:$0xff] %v826_v3  ;;  %v825_v9 = vmax.f32 %v793_v4, 0.0  ;;  %v796_v10 = vadd.f32 %v511_v6, %v231_v5  ;;  %v226_v11 = vadd.f32 %v1503_v32, %v225_v7  ;;  %v506_v12 = vadd.f32 %v1508_v33, %v505_v8 }
 0x108   :  { %v1050_v13 = vpop.f32.mrf.mxu0  ;;  %v1130_v14 = vpop.f32.mrf.mxu1 }
 0x109   :  { %857 = vst [vmem:[#allocation2 + $0x70] sm:$0xff] %v825_v9  ;;  %v828_v15 = vmax.f32 %v796_v10, 0.0  ;;  %v795_v16 = vadd.f32 %v506_v12, %v226_v11  ;;  %v241_v17 = vadd.f32 %v1050_v13, %v1503_v32  ;;  %v521_v18 = vadd.f32 %v1130_v14, %v1508_v33 }
 0x10a   :  { %v235_v19 = vpop.f32.mrf.mxu0  ;;  %v515_v20 = vpop.f32.mrf.mxu1 }
 0x10b   :  { %860 = vst [vmem:[#allocation2 + $0x88] sm:$0xff] %v828_v15  ;;  %v827_v21 = vmax.f32 %v795_v16, 0.0  ;;  %v798_v22 = vadd.f32 %v521_v18, %v241_v17  ;;  %v236_v23 = vadd.f32 %v1503_v32, %v235_v19  ;;  %v516_v24 = vadd.f32 %v1508_v33, %v515_v20 }
 0x10c   :  { %v1053_v25 = vpop.f32.mrf.mxu0  ;;  %v1133_v26 = vpop.f32.mrf.mxu1 }
 0x10d   :  { %859 = vst [vmem:[#allocation2 + $0x80] sm:$0xff] %v827_v21  ;;  %v830_v27 = vmax.f32 %v798_v22, 0.0  ;;  %v797_v28 = vadd.f32 %v516_v24, %v236_v23  ;;  %v251_v29 = vadd.f32 %v1053_v25, %v1503_v32  ;;  %v531_v30 = vadd.f32 %v1133_v26, %v1508_v33 }
 0x10e   :  { %v245_v31 = vpop.f32.mrf.mxu0  ;;  %v525_v34 = vpop.f32.mrf.mxu1 }
 0x10f   :  { %862 = vst [vmem:[#allocation2 + $0x98] sm:$0xff] %v830_v27  ;;  %v829_v35 = vmax.f32 %v797_v28, 0.0  ;;  %v800_v36 = vadd.f32 %v531_v30, %v251_v29  ;;  %v246_v37 = vadd.f32 %v1503_v32, %v245_v31  ;;  %v526_v38 = vadd.f32 %v1508_v33, %v525_v34 }
 0x110   :  { %v1056_v39 = vpop.f32.mrf.mxu0  ;;  %v1136_v40 = vpop.f32.mrf.mxu1 }
 0x111   :  { %861 = vst [vmem:[#allocation2 + $0x90] sm:$0xff] %v829_v35  ;;  %v832_v41 = vmax.f32 %v800_v36, 0.0  ;;  %v799_v42 = vadd.f32 %v526_v38, %v246_v37  ;;  %v261_v43 = vadd.f32 %v1056_v39, %v1503_v32  ;;  %v541_v44 = vadd.f32 %v1136_v40, %v1508_v33 }
 0x112   :  { %v255_v45 = vpop.f32.mrf.mxu0  ;;  %v535_v46 = vpop.f32.mrf.mxu1 }
 0x113   :  { %864 = vst [vmem:[#allocation2 + $0xa8] sm:$0xff] %v832_v41  ;;  %v831_v47 = vmax.f32 %v799_v42, 0.0  ;;  %v802_v48 = vadd.f32 %v541_v44, %v261_v43  ;;  %v256_v49 = vadd.f32 %v1503_v32, %v255_v45  ;;  %v536_v50 = vadd.f32 %v1508_v33, %v535_v46 }
 0x114   :  { %v1059_v51 = vpop.f32.mrf.mxu0  ;;  %v1139_v52 = vpop.f32.mrf.mxu1 }
 0x115   :  { %863 = vst [vmem:[#allocation2 + $0xa0] sm:$0xff] %v831_v47  ;;  %v834_v53 = vmax.f32 %v802_v48, 0.0  ;;  %v801_v54 = vadd.f32 %v536_v50, %v256_v49  ;;  %v271_v55 = vadd.f32 %v1059_v51, %v1503_v32 }
 0x116   :  { %v265_v56 = vpop.f32.mrf.mxu0  ;;  %v545_v57 = vpop.f32.mrf.mxu1 }
 0x117   :  { %866 = vst [vmem:[#allocation2 + $0xb8] sm:$0xff] %v834_v53  ;;  %v833_v58 = vmax.f32 %v801_v54, 0.0  ;;  %v836_v59 = vmax.f32 %v271_v55, 0.0  ;;  %v266_v60 = vadd.f32 %v1503_v32, %v265_v56  ;;  %v546_v61 = vadd.f32 %v1508_v33, %v545_v57 }
 0x118   :  { %v1062_v62 = vpop.f32.mrf.mxu0  ;;  %v1142_v63 = vpop.f32.mrf.mxu1 }
 0x119   :  { %865 = vst [vmem:[#allocation2 + $0xb0] sm:$0xff] %v833_v58  ;;  %868 = vst [vmem:[#allocation2 + $0xc8] sm:$0xff] %v836_v59  ;;  %v803_v0 = vadd.f32 %v546_v61, %v266_v60  ;;  %v281_v1 = vadd.f32 %v1062_v62, %v1503_v32 }
 0x11a   :  { %v275_v2 = vpop.f32.mrf.mxu0  ;;  %v555_v3 = vpop.f32.mrf.mxu1 }
 0x11b   :  { %v835_v4 = vmax.f32 %v803_v0, 0.0  ;;  %v838_v5 = vmax.f32 %v281_v1, 0.0  ;;  %v276_v6 = vadd.f32 %v1503_v32, %v275_v2 }
 0x11c   :  { %v1065_v7 = vpop.f32.mrf.mxu0  ;;  %v1145_v8 = vpop.f32.mrf.mxu1 }
 0x11d   :  { %867 = vst [vmem:[#allocation2 + $0xc0] sm:$0xff] %v835_v4  ;;  %870 = vst [vmem:[#allocation2 + $0xd8] sm:$0xff] %v838_v5  ;;  %v837_v9 = vmax.f32 %v276_v6, 0.0  ;;  %v291_v33 = vadd.f32 %v1065_v7, %v1503_v32 }
 0x11e   :  { %v285_v10 = vpop.f32.mrf.mxu0  ;;  %v565_v11 = vpop.f32.mrf.mxu1 }
 0x11f   :  { %869 = vst [vmem:[#allocation2 + $0xd0] sm:$0xff] %v837_v9  ;;  %v840_v12 = vmax.f32 %v291_v33, 0.0  ;;  %v286_v13 = vadd.f32 %v1503_v32, %v285_v10 }
 0x120   :  { %v1068_v14 = vpop.f32.mrf.mxu0  ;;  %v1148_v15 = vpop.f32.mrf.mxu1 }
 0x121   :  { %872 = vst [vmem:[#allocation2 + $0xe8] sm:$0xff] %v840_v12  ;;  %v839_v16 = vmax.f32 %v286_v13, 0.0  ;;  %v301_v17 = vadd.f32 %v1068_v14, %v1503_v32 }
 0x122   :  { %v295_v18 = vpop.f32.mrf.mxu0  ;;  %v575_v19 = vpop.f32.mrf.mxu1 }
 0x123   :  { %871 = vst [vmem:[#allocation2 + $0xe0] sm:$0xff] %v839_v16  ;;  %v842_v20 = vmax.f32 %v301_v17, 0.0  ;;  %v296_v21 = vadd.f32 %v1503_v32, %v295_v18 }
 0x125   :  { %874 = vst [vmem:[#allocation2 + $0xf8] sm:$0xff] %v842_v20  ;;  %v841_v22 = vmax.f32 %v296_v21, 0.0 }
 0x127   :  { %873 = vst [vmem:[#allocation2 + $0xf0] sm:$0xff] %v841_v22 }
 0x128   :  { %1163 = shalt.err (!%p1160_p4)
}
 0x129   :  { %s1175_s5 = smov 128   ;;  %s1176_s15 = smov 8  }
 0x12a   :  { %886 = dma.vmem_to_hbm [thread:$0]  %s881_s1, 4096, %s1576_s6, [#allocation3], %s1175_s5, %s1175_s5, %s1176_s15  }
 0x12b   :  { %1172 = dma.done.wait [#allocation3], 4096  }
 0x12c   :  { %1173 = vsyncadd [#allocation3], 4294963200 }
 0x12d   :  { %890 = vsyncpa [#allocation3], 1 }

</bundles_post_ra>
